<compile_context>
chip_gen: v7x
topology: tpu7x:2x2x1
jax: 0.10.0
libtpu: 0.0.40
codegen_flags: <defaults>
</compile_context>

<pallas_src>
from functools import partial

import jax
import jax.numpy as jnp
from jax import lax
from jax.experimental import pallas as pl
from jax.experimental.pallas import tpu as pltpu

EPS = 1e-5  # nn.LayerNorm default eps


def _layer_norm(x, gamma, beta):
    mu = jnp.mean(x, axis=-1, keepdims=True)
    var = jnp.mean((x - mu) ** 2, axis=-1, keepdims=True)
    return (x - mu) * lax.rsqrt(var + EPS) * gamma + beta


def _largest_divisor_leq(n, cap):
    for c in range(min(n, cap), 0, -1):
        if n % c == 0:
            return c
    return n


def transformer_layer_kernel(x_ref, mask_ref,
                             ln1_g_ref, ln1_b_ref,
                             wqkv_ref, bqkv_ref,
                             wo_ref, bo_ref,
                             ln2_g_ref, ln2_b_ref,
                             w1_ref, b1_ref,
                             w2_ref, b2_ref,
                             o_ref,
                             *, nhead, kv_chunk, ff_chunk):
    f32, bf16 = jnp.float32, jnp.bfloat16
    Bt, S, E = x_ref.shape
    H = nhead
    D = E // H
    G = Bt * H                       # combined (batch_block, head) dim for attention
    R = Bt * S                       # flattened rows for all row-wise matmuls
    L = w1_ref.shape[1]

    x = x_ref[...].astype(f32)                         # (Bt, S, E)
    xf = x.reshape(R, E)                               # (R, E), b-major rows

    # ---- LayerNorm 1 (f32 statistics) ----
    xn = _layer_norm(xf, ln1_g_ref[...], ln1_b_ref[...])

    # ---- fused QKV: ONE (R, E) @ (E, 3E) MXU matmul (scale folded into Q) ----
    qkv = jnp.dot(xn.astype(bf16), wqkv_ref[...],
                  preferred_element_type=f32) + bqkv_ref[...]          # (R, 3E)
    qkv3 = qkv.reshape(Bt, S, 3 * E)

    def gather_heads(base):
        # (Bt, S, 3E) lane slices -> (G, S, D) with head-major leading ordering
        parts = [qkv3[:, :, base + h * D: base + (h + 1) * D] for h in range(H)]
        return jnp.stack(parts, axis=0).reshape(G, S, D).astype(bf16)

    qh = gather_heads(0)          # (G, S, D) bf16, already scaled by 1/sqrt(D)
    kh = gather_heads(E)
    vh = gather_heads(2 * E)

    # ---- attention: KV-chunked online softmax (scores bounded to (G,S,kv_chunk)) ----
    mask = mask_ref[...]                                # (S, S) additive f32 mask
    m_i = jnp.full((G, S, 1), -1e30, dtype=f32)
    l_i = jnp.zeros((G, S, 1), dtype=f32)
    acc = jnp.zeros((G, S, D), dtype=f32)
    for c0 in range(0, S, kv_chunk):
        kc = kh[:, c0:c0 + kv_chunk, :]
        vc = vh[:, c0:c0 + kv_chunk, :]
        s = jnp.einsum("gqd,gkd->gqk", qh, kc, preferred_element_type=f32)
        s = s + mask[None, :, c0:c0 + kv_chunk]
        m_new = jnp.maximum(m_i, jnp.max(s, axis=-1, keepdims=True))
        alpha = jnp.exp(m_i - m_new)
        p = jnp.exp(s - m_new)
        l_i = alpha * l_i + jnp.sum(p, axis=-1, keepdims=True)
        acc = alpha * acc + jnp.einsum("gqk,gkd->gqd", p.astype(bf16), vc,
                                       preferred_element_type=f32)
        m_i = m_new
    ctx = acc * pl.reciprocal(l_i, approx=True)         # normalize on the EUP

    # ---- output projection: heads back into lanes, ONE (R, E) @ (E, E) matmul ----
    ctx_r = ctx.reshape(H, Bt, S, D)
    ctx_cat = jnp.concatenate([ctx_r[h] for h in range(H)], axis=-1)    # (Bt, S, E)
    att = jnp.dot(ctx_cat.reshape(R, E).astype(bf16), wo_ref[...],
                  preferred_element_type=f32) + bo_ref[...]             # (R, E)

    # ---- residual 1 + LayerNorm 2 ----
    y = xf + att
    yn = _layer_norm(y, ln2_g_ref[...], ln2_b_ref[...])

    # ---- feed-forward, chunked over the hidden width L (f32 accumulator) ----
    yb = yn.astype(bf16)
    ff = jnp.zeros((R, E), dtype=f32)
    for c0 in range(0, L, ff_chunk):
        h_c = jnp.dot(yb, w1_ref[:, c0:c0 + ff_chunk], preferred_element_type=f32)
        h_c = jnp.maximum(h_c + b1_ref[:, c0:c0 + ff_chunk], 0.0)
        ff = ff + jnp.dot(h_c.astype(bf16), w2_ref[c0:c0 + ff_chunk, :],
                          preferred_element_type=f32)
    ff = ff + b2_ref[...]

    # ---- residual 2 ----
    # TODO(synk): nn.Dropout(0.2) is stochastic in train mode; eval-mode identity here.
    z = y + ff
    o_ref[...] = z.reshape(Bt, S, E).astype(o_ref.dtype)


def prepare_params(params, *, nhead):
    """Fuse Wq/Wk/Wv into one (E, 3E) weight, fold 1/sqrt(D) into its Q third,
    cast matmul weights to bf16 (biases / LN params stay f32)."""
    bf16, f32 = jnp.bfloat16, jnp.float32
    E = params["wo"].shape[0]
    D = E // nhead
    scale = 1.0 / float(D) ** 0.5
    col_scale = jnp.concatenate(
        [jnp.full((1, E), scale, f32), jnp.ones((1, 2 * E), f32)], axis=1)
    return dict(
        ln1_g=params["ln1_g"].astype(f32), ln1_b=params["ln1_b"].astype(f32),
        wqkv=(params["wqkv"] * col_scale).astype(bf16),     # (E, 3E)
        bqkv=(params["bqkv"] * col_scale).astype(f32),      # (1, 3E)
        wo=params["wo"].astype(bf16), bo=params["bo"].astype(f32),
        ln2_g=params["ln2_g"].astype(f32), ln2_b=params["ln2_b"].astype(f32),
        w1=params["w1"].astype(bf16), b1=params["b1"].astype(f32),
        w2=params["w2"].astype(bf16), b2=params["b2"].astype(f32),
    )


def _pick_block_b(B, S, E, L, H, kv_chunk, ff_chunk, budget_bytes):
    """Byte-aware batch-block choice; prefers an even grid (>=2) for v7x megacore."""
    D = E // H

    def step_bytes(bb):
        R, G = bb * S, bb * H
        io = 2 * 2 * (bb * S * E * 2)                                  # 2x-buffered bf16 in/out
        w = 2 * ((3 * E * E + E * E + 2 * E * L) * 2                   # bf16 weights (2x-buffered)
                 + (8 * E + L) * 4 + S * S * 4)                        # biases / LN / mask f32
        act = (R * E * 4 * 6 + R * 3 * E * 4                           # row-wise f32 intermediates
               + G * S * D * (3 * 2 + 4)                               # q,k,v bf16 + acc f32
               + G * S * kv_chunk * 4 * 2                              # scores + probs (one chunk)
               + R * ff_chunk * 4)                                     # FFN hidden chunk
        return io + w + act

    cands = [bb for bb in range(1, B + 1)
             if B % bb == 0 and step_bytes(bb) <= budget_bytes]
    if not cands:
        return 1
    even = [bb for bb in cands if (B // bb) % 2 == 0]
    return max(even) if even else max(cands)


def transformer_layer(x_sbe, attn_mask, params, *, nhead, block_b=None):
    """x_sbe: (seq_len, batch, embed), like the PyTorch module.  Returns (z, None)."""
    S, B, E = x_sbe.shape
    assert E % nhead == 0
    L = params["w1"].shape[1]
    kp = prepare_params(params, nhead=nhead)

    kv_chunk = _largest_divisor_leq(S, 512)
    ff_chunk = _largest_divisor_leq(L, 1024)

    try:
        vmem_cap = pltpu.get_tpu_info().vmem_capacity_bytes
    except Exception:
        vmem_cap = 64 * 1024 * 1024
    vmem_limit = int(min(vmem_cap * 3 // 4, 100 * 1024 * 1024))

    if block_b is None:
        block_b = _pick_block_b(B, S, E, L, nhead, kv_chunk, ff_chunk,
                                int(vmem_limit * 0.85))
    grid_b = B // block_b

    # bf16 activations across the pallas_call boundary (cast fuses with the transpose).
    # TODO(synk): transposes kept -- see header note on seq-first layout vs BlockSpec tiling.
    x = jnp.transpose(x_sbe, (1, 0, 2)).astype(jnp.bfloat16)          # (B, S, E) bf16
    mask = attn_mask.astype(jnp.float32)

    def full(shape):
        return pl.BlockSpec(shape, lambda b: (0,) * len(shape))

    out = pl.pallas_call(
        partial(transformer_layer_kernel, nhead=nhead,
                kv_chunk=kv_chunk, ff_chunk=ff_chunk),
        out_shape=jax.ShapeDtypeStruct((B, S, E), jnp.bfloat16),
        grid=(grid_b,),
        in_specs=[
            pl.BlockSpec((block_b, S, E), lambda b: (b, 0, 0)),        # x block (bf16)
            full((S, S)),                                              # additive attn mask
            full((1, E)), full((1, E)),                                # ln1 gamma/beta
            full((E, 3 * E)), full((1, 3 * E)),                        # fused Wqkv / bqkv
            full((E, E)), full((1, E)),                                # wo / bo
            full((1, E)), full((1, E)),                                # ln2 gamma/beta
            full((E, L)), full((1, L)),                                # ff1 W^T / b
            full((L, E)), full((1, E)),                                # ff2 W^T / b
        ],
        out_specs=pl.BlockSpec((block_b, S, E), lambda b: (b, 0, 0)),
        compiler_params=pltpu.CompilerParams(
            dimension_semantics=("parallel",),
            vmem_limit_bytes=vmem_limit),
    )(x, mask,
      kp["ln1_g"], kp["ln1_b"],
      kp["wqkv"], kp["bqkv"],
      kp["wo"], kp["bo"],
      kp["ln2_g"], kp["ln2_b"],
      kp["w1"], kp["b1"],
      kp["w2"], kp["b2"])

    z = jnp.transpose(out, (1, 0, 2)).astype(x_sbe.dtype)              # back to (S, B, E)
    # need_attn_weights=False -> PyTorch MHA returns attn_weights=None
    return z, None


def init_params(key, embed_size, layer_width):
    ks = jax.random.split(key, 6)
    f32 = jnp.float32
    s = 0.05
    return {
        "ln1_g": jnp.ones((1, embed_size), f32),
        "ln1_b": jnp.zeros((1, embed_size), f32),
        # stored pre-transposed: (in_features, out_features)
        "wqkv": s * jax.random.normal(ks[0], (embed_size, 3 * embed_size), f32),
        "bqkv": jnp.zeros((1, 3 * embed_size), f32),
        "wo":   s * jax.random.normal(ks[1], (embed_size, embed_size), f32),
        "bo":   jnp.zeros((1, embed_size), f32),
        "ln2_g": jnp.ones((1, embed_size), f32),
        "ln2_b": jnp.zeros((1, embed_size), f32),
        "w1": s * jax.random.normal(ks[2], (embed_size, layer_width), f32),
        "b1": 0.01 * jax.random.normal(ks[3], (1, layer_width), f32),
        "w2": s * jax.random.normal(ks[4], (layer_width, embed_size), f32),
        "b2": 0.01 * jax.random.normal(ks[5], (1, embed_size), f32),
    }


def reference_forward(x_sbe, attn_mask, params, *, nhead):
    """Pure-jnp mirror of the kernel numerics (bf16 matmul operands and I/O,
    f32 accumulation, eval-mode dropout) for validation."""
    bf16, f32 = jnp.bfloat16, jnp.float32
    kp = prepare_params(params, nhead=nhead)
    S, B, E = x_sbe.shape
    H = nhead
    D = E // H

    x = jnp.transpose(x_sbe, (1, 0, 2)).astype(bf16).astype(f32)       # (B, S, E)
    xn = _layer_norm(x, kp["ln1_g"], kp["ln1_b"])
    qkv = jnp.einsum("bse,ef->bsf", xn.astype(bf16), kp["wqkv"],
                     preferred_element_type=f32) + kp["bqkv"]
    q = qkv[..., :E].reshape(B, S, H, D).transpose(0, 2, 1, 3)
    k = qkv[..., E:2 * E].reshape(B, S, H, D).transpose(0, 2, 1, 3)
    v = qkv[..., 2 * E:].reshape(B, S, H, D).transpose(0, 2, 1, 3)
    s = jnp.einsum("bhqd,bhkd->bhqk", q.astype(bf16), k.astype(bf16),
                   preferred_element_type=f32) + attn_mask[None, None]
    p = jnp.exp(s - jnp.max(s, axis=-1, keepdims=True))
    l = jnp.sum(p, axis=-1, keepdims=True)
    ctx = jnp.einsum("bhqk,bhkd->bhqd", p.astype(bf16), v.astype(bf16),
                     preferred_element_type=f32) / l
    ctx_cat = ctx.transpose(0, 2, 1, 3).reshape(B, S, E)
    att = jnp.einsum("bse,ef->bsf", ctx_cat.astype(bf16), kp["wo"],
                     preferred_element_type=f32) + kp["bo"]
    y = x + att
    yn = _layer_norm(y, kp["ln2_g"], kp["ln2_b"])
    hdn = jnp.maximum(jnp.einsum("bse,el->bsl", yn.astype(bf16), kp["w1"],
                                 preferred_element_type=f32) + kp["b1"], 0.0)
    ff = jnp.einsum("bsl,le->bse", hdn.astype(bf16), kp["w2"],
                    preferred_element_type=f32) + kp["b2"]
    z = (y + ff).astype(bf16)
    return jnp.transpose(z, (1, 0, 2)).astype(x_sbe.dtype)


if __name__ == "__main__":
    SEQ, BATCH, EMBED, NHEAD, LAYER_WIDTH = 8, 2, 32, 4, 256

    key = jax.random.PRNGKey(0)
    kx, kparam = jax.random.split(key)
    x = jax.random.normal(kx, (SEQ, BATCH, EMBED), jnp.float32)   # (seq, batch, embed)
    params = init_params(kparam, EMBED, LAYER_WIDTH)

    # causal additive mask: 0 on/below diagonal, large negative above
    idx = jnp.arange(SEQ)
    attn_mask = jnp.where(idx[:, None] >= idx[None, :], 0.0, -1e9).astype(jnp.float32)

    z, att_w = transformer_layer(x, attn_mask, params, nhead=NHEAD)
    z = jax.block_until_ready(z)

    z_ref = reference_forward(x, attn_mask, params, nhead=NHEAD)
    assert z.shape == (SEQ, BATCH, EMBED)
    assert att_w is None
    assert jnp.allclose(z, z_ref, rtol=2e-2, atol=2e-2), "mismatch vs jnp reference"

    print("KERNEL_OK")
</pallas_src>

<mosaic_0001>
module attributes {stable_mosaic.version = 11 : i64} {
  func.func @transformer_layer_kernel(%arg0: i32, %arg1: memref<1x8x32xbf16, #tpu.memory_space<vmem>>, %arg2: memref<8x8xf32, #tpu.memory_space<vmem>>, %arg3: memref<1x32xf32, #tpu.memory_space<vmem>>, %arg4: memref<1x32xf32, #tpu.memory_space<vmem>>, %arg5: memref<32x96xbf16, #tpu.memory_space<vmem>>, %arg6: memref<1x96xf32, #tpu.memory_space<vmem>>, %arg7: memref<32x32xbf16, #tpu.memory_space<vmem>>, %arg8: memref<1x32xf32, #tpu.memory_space<vmem>>, %arg9: memref<1x32xf32, #tpu.memory_space<vmem>>, %arg10: memref<1x32xf32, #tpu.memory_space<vmem>>, %arg11: memref<32x256xbf16, #tpu.memory_space<vmem>>, %arg12: memref<1x256xf32, #tpu.memory_space<vmem>>, %arg13: memref<256x32xbf16, #tpu.memory_space<vmem>>, %arg14: memref<1x32xf32, #tpu.memory_space<vmem>>, %arg15: memref<1x8x32xbf16, #tpu.memory_space<vmem>>) attributes {dimension_semantics = [#tpu.dimension_semantics<parallel>], iteration_bounds = array<i64: 2>, scalar_prefetch = 0 : i64, scratch_operands = 0 : i64, tpu.core_type = #tpu.core_type<tc>, window_params = [{transform_indices = @transform_0, window_bounds = array<i64: 1, 8, 32>}, {pipeline_mode = #tpu.pipeline_mode<synchronous>, transform_indices = @transform_1, window_bounds = array<i64: 8, 8>}, {pipeline_mode = #tpu.pipeline_mode<synchronous>, transform_indices = @transform_2, window_bounds = array<i64: 1, 32>}, {pipeline_mode = #tpu.pipeline_mode<synchronous>, transform_indices = @transform_3, window_bounds = array<i64: 1, 32>}, {pipeline_mode = #tpu.pipeline_mode<synchronous>, transform_indices = @transform_4, window_bounds = array<i64: 32, 96>}, {pipeline_mode = #tpu.pipeline_mode<synchronous>, transform_indices = @transform_5, window_bounds = array<i64: 1, 96>}, {pipeline_mode = #tpu.pipeline_mode<synchronous>, transform_indices = @transform_6, window_bounds = array<i64: 32, 32>}, {pipeline_mode = #tpu.pipeline_mode<synchronous>, transform_indices = @transform_7, window_bounds = array<i64: 1, 32>}, {pipeline_mode = #tpu.pipeline_mode<synchronous>, transform_indices = @transform_8, window_bounds = array<i64: 1, 32>}, {pipeline_mode = #tpu.pipeline_mode<synchronous>, transform_indices = @transform_9, window_bounds = array<i64: 1, 32>}, {pipeline_mode = #tpu.pipeline_mode<synchronous>, transform_indices = @transform_10, window_bounds = array<i64: 32, 256>}, {pipeline_mode = #tpu.pipeline_mode<synchronous>, transform_indices = @transform_11, window_bounds = array<i64: 1, 256>}, {pipeline_mode = #tpu.pipeline_mode<synchronous>, transform_indices = @transform_12, window_bounds = array<i64: 256, 32>}, {pipeline_mode = #tpu.pipeline_mode<synchronous>, transform_indices = @transform_13, window_bounds = array<i64: 1, 32>}, {transform_indices = @transform_14, window_bounds = array<i64: 1, 8, 32>}]} {
    %c0 = arith.constant 0 : index
    %c0_0 = arith.constant 0 : index
    %c0_1 = arith.constant 0 : index
    %0 = vector.load %arg1[%c0, %c0_0, %c0_1] : memref<1x8x32xbf16, #tpu.memory_space<vmem>>, vector<1x8x32xbf16>
    %1 = arith.extf %0 : vector<1x8x32xbf16> to vector<1x8x32xf32>
    %2 = vector.shape_cast %1 : vector<1x8x32xf32> to vector<8x32xf32>
    %c0_2 = arith.constant 0 : index
    %c0_3 = arith.constant 0 : index
    %3 = vector.load %arg3[%c0_2, %c0_3] : memref<1x32xf32, #tpu.memory_space<vmem>>, vector<1x32xf32>
    %c0_4 = arith.constant 0 : index
    %c0_5 = arith.constant 0 : index
    %4 = vector.load %arg4[%c0_4, %c0_5] : memref<1x32xf32, #tpu.memory_space<vmem>>, vector<1x32xf32>
    %cst = arith.constant dense<0.000000e+00> : vector<8xf32>
    %5 = vector.multi_reduction <add>, %2, %cst [1] : vector<8x32xf32> to vector<8xf32>
    %6 = vector.shape_cast %5 : vector<8xf32> to vector<8x1xf32>
    %cst_6 = arith.constant 3.200000e+01 : f32
    %7 = vector.broadcast %cst_6 : f32 to vector<8x1xf32>
    %8 = arith.divf %6, %7 : vector<8x1xf32>
    %9 = vector.broadcast %8 : vector<8x1xf32> to vector<8x32xf32>
    %10 = arith.subf %2, %9 : vector<8x32xf32>
    %11 = arith.mulf %10, %10 : vector<8x32xf32>
    %cst_7 = arith.constant dense<0.000000e+00> : vector<8xf32>
    %12 = vector.multi_reduction <add>, %11, %cst_7 [1] : vector<8x32xf32> to vector<8xf32>
    %13 = vector.shape_cast %12 : vector<8xf32> to vector<8x1xf32>
    %cst_8 = arith.constant 3.200000e+01 : f32
    %14 = vector.broadcast %cst_8 : f32 to vector<8x1xf32>
    %15 = arith.divf %13, %14 : vector<8x1xf32>
    %16 = vector.broadcast %8 : vector<8x1xf32> to vector<8x32xf32>
    %17 = arith.subf %2, %16 : vector<8x32xf32>
    %cst_9 = arith.constant 9.99999974E-6 : f32
    %18 = vector.broadcast %cst_9 : f32 to vector<8x1xf32>
    %19 = arith.addf %15, %18 : vector<8x1xf32>
    %20 = math.rsqrt %19 : vector<8x1xf32>
    %21 = vector.broadcast %20 : vector<8x1xf32> to vector<8x32xf32>
    %22 = arith.mulf %17, %21 : vector<8x32xf32>
    %23 = vector.broadcast %3 : vector<1x32xf32> to vector<8x32xf32>
    %24 = arith.mulf %22, %23 : vector<8x32xf32>
    %25 = vector.broadcast %4 : vector<1x32xf32> to vector<8x32xf32>
    %26 = arith.addf %24, %25 : vector<8x32xf32>
    %27 = arith.truncf %26 : vector<8x32xf32> to vector<8x32xbf16>
    %c0_10 = arith.constant 0 : index
    %c0_11 = arith.constant 0 : index
    %28 = vector.load %arg5[%c0_10, %c0_11] : memref<32x96xbf16, #tpu.memory_space<vmem>>, vector<32x96xbf16>
    %cst_12 = arith.constant dense<0.000000e+00> : vector<8x96xf32>
    %29 = tpu.matmul %27, %28, %cst_12 {dimension_numbers = #tpu.dot_dimension_numbers<[1], [0], [0], [1], [0, 0, 1, 1], [], []>} : vector<8x32xbf16>, vector<32x96xbf16>, vector<8x96xf32> -> vector<8x96xf32>
    %c0_13 = arith.constant 0 : index
    %c0_14 = arith.constant 0 : index
    %30 = vector.load %arg6[%c0_13, %c0_14] : memref<1x96xf32, #tpu.memory_space<vmem>>, vector<1x96xf32>
    %31 = vector.broadcast %30 : vector<1x96xf32> to vector<8x96xf32>
    %32 = arith.addf %29, %31 : vector<8x96xf32>
    %33 = vector.shape_cast %32 : vector<8x96xf32> to vector<1x8x96xf32>
    %34 = vector.extract_strided_slice %33 {offsets = [0, 0, 0], sizes = [1, 8, 8], strides = [1, 1, 1]} : vector<1x8x96xf32> to vector<1x8x8xf32>
    %35 = vector.extract_strided_slice %33 {offsets = [0, 0, 8], sizes = [1, 8, 8], strides = [1, 1, 1]} : vector<1x8x96xf32> to vector<1x8x8xf32>
    %36 = vector.extract_strided_slice %33 {offsets = [0, 0, 16], sizes = [1, 8, 8], strides = [1, 1, 1]} : vector<1x8x96xf32> to vector<1x8x8xf32>
    %37 = vector.extract_strided_slice %33 {offsets = [0, 0, 24], sizes = [1, 8, 8], strides = [1, 1, 1]} : vector<1x8x96xf32> to vector<1x8x8xf32>
    %38 = vector.shape_cast %34 : vector<1x8x8xf32> to vector<1x1x8x8xf32>
    %39 = vector.shape_cast %35 : vector<1x8x8xf32> to vector<1x1x8x8xf32>
    %40 = vector.shape_cast %36 : vector<1x8x8xf32> to vector<1x1x8x8xf32>
    %41 = vector.shape_cast %37 : vector<1x8x8xf32> to vector<1x1x8x8xf32>
    %42 = tpu.concatenate %38, %39, %40, %41 in 0 : vector<1x1x8x8xf32>, vector<1x1x8x8xf32>, vector<1x1x8x8xf32>, vector<1x1x8x8xf32> -> vector<4x1x8x8xf32>
    %43 = vector.shape_cast %42 : vector<4x1x8x8xf32> to vector<4x8x8xf32>
    %44 = arith.truncf %43 : vector<4x8x8xf32> to vector<4x8x8xbf16>
    %45 = vector.extract_strided_slice %33 {offsets = [0, 0, 32], sizes = [1, 8, 8], strides = [1, 1, 1]} : vector<1x8x96xf32> to vector<1x8x8xf32>
    %46 = vector.extract_strided_slice %33 {offsets = [0, 0, 40], sizes = [1, 8, 8], strides = [1, 1, 1]} : vector<1x8x96xf32> to vector<1x8x8xf32>
    %47 = vector.extract_strided_slice %33 {offsets = [0, 0, 48], sizes = [1, 8, 8], strides = [1, 1, 1]} : vector<1x8x96xf32> to vector<1x8x8xf32>
    %48 = vector.extract_strided_slice %33 {offsets = [0, 0, 56], sizes = [1, 8, 8], strides = [1, 1, 1]} : vector<1x8x96xf32> to vector<1x8x8xf32>
    %49 = vector.shape_cast %45 : vector<1x8x8xf32> to vector<1x1x8x8xf32>
    %50 = vector.shape_cast %46 : vector<1x8x8xf32> to vector<1x1x8x8xf32>
    %51 = vector.shape_cast %47 : vector<1x8x8xf32> to vector<1x1x8x8xf32>
    %52 = vector.shape_cast %48 : vector<1x8x8xf32> to vector<1x1x8x8xf32>
    %53 = tpu.concatenate %49, %50, %51, %52 in 0 : vector<1x1x8x8xf32>, vector<1x1x8x8xf32>, vector<1x1x8x8xf32>, vector<1x1x8x8xf32> -> vector<4x1x8x8xf32>
    %54 = vector.shape_cast %53 : vector<4x1x8x8xf32> to vector<4x8x8xf32>
    %55 = arith.truncf %54 : vector<4x8x8xf32> to vector<4x8x8xbf16>
    %56 = vector.extract_strided_slice %33 {offsets = [0, 0, 64], sizes = [1, 8, 8], strides = [1, 1, 1]} : vector<1x8x96xf32> to vector<1x8x8xf32>
    %57 = vector.extract_strided_slice %33 {offsets = [0, 0, 72], sizes = [1, 8, 8], strides = [1, 1, 1]} : vector<1x8x96xf32> to vector<1x8x8xf32>
    %58 = vector.extract_strided_slice %33 {offsets = [0, 0, 80], sizes = [1, 8, 8], strides = [1, 1, 1]} : vector<1x8x96xf32> to vector<1x8x8xf32>
    %59 = vector.extract_strided_slice %33 {offsets = [0, 0, 88], sizes = [1, 8, 8], strides = [1, 1, 1]} : vector<1x8x96xf32> to vector<1x8x8xf32>
    %60 = vector.shape_cast %56 : vector<1x8x8xf32> to vector<1x1x8x8xf32>
    %61 = vector.shape_cast %57 : vector<1x8x8xf32> to vector<1x1x8x8xf32>
    %62 = vector.shape_cast %58 : vector<1x8x8xf32> to vector<1x1x8x8xf32>
    %63 = vector.shape_cast %59 : vector<1x8x8xf32> to vector<1x1x8x8xf32>
    %64 = tpu.concatenate %60, %61, %62, %63 in 0 : vector<1x1x8x8xf32>, vector<1x1x8x8xf32>, vector<1x1x8x8xf32>, vector<1x1x8x8xf32> -> vector<4x1x8x8xf32>
    %65 = vector.shape_cast %64 : vector<4x1x8x8xf32> to vector<4x8x8xf32>
    %66 = arith.truncf %65 : vector<4x8x8xf32> to vector<4x8x8xbf16>
    %c0_15 = arith.constant 0 : index
    %c0_16 = arith.constant 0 : index
    %67 = vector.load %arg2[%c0_15, %c0_16] : memref<8x8xf32, #tpu.memory_space<vmem>>, vector<8x8xf32>
    %cst_17 = arith.constant -1.000000e+30 : f32
    %68 = vector.broadcast %cst_17 : f32 to vector<4x8x1xf32>
    %cst_18 = arith.constant 0.000000e+00 : f32
    %69 = vector.broadcast %cst_18 : f32 to vector<4x8x1xf32>
    %cst_19 = arith.constant 0.000000e+00 : f32
    %70 = vector.broadcast %cst_19 : f32 to vector<4x8x8xf32>
    "tpu.trace_start"() <{level = 10 : i32, message = "gqd,gkd->gqk"}> : () -> ()
    %cst_20 = arith.constant dense<0.000000e+00> : vector<4x8x8xf32>
    %71 = tpu.matmul %44, %55, %cst_20 {dimension_numbers = #tpu.dot_dimension_numbers<[2], [2], [1], [1], [0, 0, 0, 1, 1, 1], [0], [0]>} : vector<4x8x8xbf16>, vector<4x8x8xbf16>, vector<4x8x8xf32> -> vector<4x8x8xf32>
    "tpu.trace_stop"() : () -> ()
    %72 = vector.shape_cast %67 : vector<8x8xf32> to vector<1x8x8xf32>
    %73 = vector.broadcast %72 : vector<1x8x8xf32> to vector<4x8x8xf32>
    %74 = arith.addf %71, %73 : vector<4x8x8xf32>
    %cst_21 = arith.constant dense<0xFF800000> : vector<4x8xf32>
    %75 = vector.multi_reduction <maximumf>, %74, %cst_21 [2] : vector<4x8x8xf32> to vector<4x8xf32>
    %76 = vector.shape_cast %75 : vector<4x8xf32> to vector<4x8x1xf32>
    %77 = arith.maximumf %68, %76 : vector<4x8x1xf32>
    %78 = arith.subf %68, %77 : vector<4x8x1xf32>
    %79 = math.exp %78 : vector<4x8x1xf32>
    %80 = vector.broadcast %77 : vector<4x8x1xf32> to vector<4x8x8xf32>
    %81 = arith.subf %74, %80 : vector<4x8x8xf32>
    %82 = math.exp %81 : vector<4x8x8xf32>
    %83 = arith.mulf %79, %69 : vector<4x8x1xf32>
    %cst_22 = arith.constant dense<0.000000e+00> : vector<4x8xf32>
    %84 = vector.multi_reduction <add>, %82, %cst_22 [2] : vector<4x8x8xf32> to vector<4x8xf32>
    %85 = vector.shape_cast %84 : vector<4x8xf32> to vector<4x8x1xf32>
    %86 = arith.addf %83, %85 : vector<4x8x1xf32>
    %87 = vector.broadcast %79 : vector<4x8x1xf32> to vector<4x8x8xf32>
    %88 = arith.mulf %87, %70 : vector<4x8x8xf32>
    %89 = arith.truncf %82 : vector<4x8x8xf32> to vector<4x8x8xbf16>
    "tpu.trace_start"() <{level = 10 : i32, message = "gqk,gkd->gqd"}> : () -> ()
    %cst_23 = arith.constant dense<0.000000e+00> : vector<4x8x8xf32>
    %90 = tpu.matmul %89, %66, %cst_23 {dimension_numbers = #tpu.dot_dimension_numbers<[2], [1], [1], [2], [0, 0, 0, 1, 1, 2], [0], [0]>} : vector<4x8x8xbf16>, vector<4x8x8xbf16>, vector<4x8x8xf32> -> vector<4x8x8xf32>
    "tpu.trace_stop"() : () -> ()
    %91 = arith.addf %88, %90 : vector<4x8x8xf32>
    %92 = tpu.reciprocal %86 {approx = true} : vector<4x8x1xf32> -> vector<4x8x1xf32>
    %93 = vector.broadcast %92 : vector<4x8x1xf32> to vector<4x8x8xf32>
    %94 = arith.mulf %91, %93 : vector<4x8x8xf32>
    %95 = vector.shape_cast %94 : vector<4x8x8xf32> to vector<4x1x8x8xf32>
    %96 = vector.extract_strided_slice %95 {offsets = [0, 0, 0, 0], sizes = [1, 1, 8, 8], strides = [1, 1, 1, 1]} : vector<4x1x8x8xf32> to vector<1x1x8x8xf32>
    %97 = vector.shape_cast %96 : vector<1x1x8x8xf32> to vector<1x8x8xf32>
    %98 = vector.extract_strided_slice %95 {offsets = [1, 0, 0, 0], sizes = [1, 1, 8, 8], strides = [1, 1, 1, 1]} : vector<4x1x8x8xf32> to vector<1x1x8x8xf32>
    %99 = vector.shape_cast %98 : vector<1x1x8x8xf32> to vector<1x8x8xf32>
    %100 = vector.extract_strided_slice %95 {offsets = [2, 0, 0, 0], sizes = [1, 1, 8, 8], strides = [1, 1, 1, 1]} : vector<4x1x8x8xf32> to vector<1x1x8x8xf32>
    %101 = vector.shape_cast %100 : vector<1x1x8x8xf32> to vector<1x8x8xf32>
    %102 = vector.extract_strided_slice %95 {offsets = [3, 0, 0, 0], sizes = [1, 1, 8, 8], strides = [1, 1, 1, 1]} : vector<4x1x8x8xf32> to vector<1x1x8x8xf32>
    %103 = vector.shape_cast %102 : vector<1x1x8x8xf32> to vector<1x8x8xf32>
    %104 = tpu.concatenate %97, %99, %101, %103 in 2 : vector<1x8x8xf32>, vector<1x8x8xf32>, vector<1x8x8xf32>, vector<1x8x8xf32> -> vector<1x8x32xf32>
    %105 = vector.shape_cast %104 : vector<1x8x32xf32> to vector<8x32xf32>
    %106 = arith.truncf %105 : vector<8x32xf32> to vector<8x32xbf16>
    %c0_24 = arith.constant 0 : index
    %c0_25 = arith.constant 0 : index
    %107 = vector.load %arg7[%c0_24, %c0_25] : memref<32x32xbf16, #tpu.memory_space<vmem>>, vector<32x32xbf16>
    %cst_26 = arith.constant dense<0.000000e+00> : vector<8x32xf32>
    %108 = tpu.matmul %106, %107, %cst_26 {dimension_numbers = #tpu.dot_dimension_numbers<[1], [0], [0], [1], [0, 0, 1, 1], [], []>} : vector<8x32xbf16>, vector<32x32xbf16>, vector<8x32xf32> -> vector<8x32xf32>
    %c0_27 = arith.constant 0 : index
    %c0_28 = arith.constant 0 : index
    %109 = vector.load %arg8[%c0_27, %c0_28] : memref<1x32xf32, #tpu.memory_space<vmem>>, vector<1x32xf32>
    %110 = vector.broadcast %109 : vector<1x32xf32> to vector<8x32xf32>
    %111 = arith.addf %108, %110 : vector<8x32xf32>
    %112 = arith.addf %2, %111 : vector<8x32xf32>
    %c0_29 = arith.constant 0 : index
    %c0_30 = arith.constant 0 : index
    %113 = vector.load %arg9[%c0_29, %c0_30] : memref<1x32xf32, #tpu.memory_space<vmem>>, vector<1x32xf32>
    %c0_31 = arith.constant 0 : index
    %c0_32 = arith.constant 0 : index
    %114 = vector.load %arg10[%c0_31, %c0_32] : memref<1x32xf32, #tpu.memory_space<vmem>>, vector<1x32xf32>
    %cst_33 = arith.constant dense<0.000000e+00> : vector<8xf32>
    %115 = vector.multi_reduction <add>, %112, %cst_33 [1] : vector<8x32xf32> to vector<8xf32>
    %116 = vector.shape_cast %115 : vector<8xf32> to vector<8x1xf32>
    %cst_34 = arith.constant 3.200000e+01 : f32
    %117 = vector.broadcast %cst_34 : f32 to vector<8x1xf32>
    %118 = arith.divf %116, %117 : vector<8x1xf32>
    %119 = vector.broadcast %118 : vector<8x1xf32> to vector<8x32xf32>
    %120 = arith.subf %112, %119 : vector<8x32xf32>
    %121 = arith.mulf %120, %120 : vector<8x32xf32>
    %cst_35 = arith.constant dense<0.000000e+00> : vector<8xf32>
    %122 = vector.multi_reduction <add>, %121, %cst_35 [1] : vector<8x32xf32> to vector<8xf32>
    %123 = vector.shape_cast %122 : vector<8xf32> to vector<8x1xf32>
    %cst_36 = arith.constant 3.200000e+01 : f32
    %124 = vector.broadcast %cst_36 : f32 to vector<8x1xf32>
    %125 = arith.divf %123, %124 : vector<8x1xf32>
    %126 = vector.broadcast %118 : vector<8x1xf32> to vector<8x32xf32>
    %127 = arith.subf %112, %126 : vector<8x32xf32>
    %cst_37 = arith.constant 9.99999974E-6 : f32
    %128 = vector.broadcast %cst_37 : f32 to vector<8x1xf32>
    %129 = arith.addf %125, %128 : vector<8x1xf32>
    %130 = math.rsqrt %129 : vector<8x1xf32>
    %131 = vector.broadcast %130 : vector<8x1xf32> to vector<8x32xf32>
    %132 = arith.mulf %127, %131 : vector<8x32xf32>
    %133 = vector.broadcast %113 : vector<1x32xf32> to vector<8x32xf32>
    %134 = arith.mulf %132, %133 : vector<8x32xf32>
    %135 = vector.broadcast %114 : vector<1x32xf32> to vector<8x32xf32>
    %136 = arith.addf %134, %135 : vector<8x32xf32>
    %137 = arith.truncf %136 : vector<8x32xf32> to vector<8x32xbf16>
    %cst_38 = arith.constant 0.000000e+00 : f32
    %138 = vector.broadcast %cst_38 : f32 to vector<8x32xf32>
    %c0_39 = arith.constant 0 : index
    %c0_40 = arith.constant 0 : index
    %139 = vector.load %arg11[%c0_39, %c0_40] : memref<32x256xbf16, #tpu.memory_space<vmem>>, vector<32x256xbf16>
    %cst_41 = arith.constant dense<0.000000e+00> : vector<8x256xf32>
    %140 = tpu.matmul %137, %139, %cst_41 {dimension_numbers = #tpu.dot_dimension_numbers<[1], [0], [0], [1], [0, 0, 1, 1], [], []>} : vector<8x32xbf16>, vector<32x256xbf16>, vector<8x256xf32> -> vector<8x256xf32>
    %c0_42 = arith.constant 0 : index
    %c0_43 = arith.constant 0 : index
    %141 = vector.load %arg12[%c0_42, %c0_43] : memref<1x256xf32, #tpu.memory_space<vmem>>, vector<1x256xf32>
    %142 = vector.broadcast %141 : vector<1x256xf32> to vector<8x256xf32>
    %143 = arith.addf %140, %142 : vector<8x256xf32>
    %cst_44 = arith.constant 0.000000e+00 : f32
    %144 = vector.broadcast %cst_44 : f32 to vector<8x256xf32>
    %145 = arith.maximumf %143, %144 : vector<8x256xf32>
    %146 = arith.truncf %145 : vector<8x256xf32> to vector<8x256xbf16>
    %c0_45 = arith.constant 0 : index
    %c0_46 = arith.constant 0 : index
    %147 = vector.load %arg13[%c0_45, %c0_46] : memref<256x32xbf16, #tpu.memory_space<vmem>>, vector<256x32xbf16>
    %cst_47 = arith.constant dense<0.000000e+00> : vector<8x32xf32>
    %148 = tpu.matmul %146, %147, %cst_47 {dimension_numbers = #tpu.dot_dimension_numbers<[1], [0], [0], [1], [0, 0, 1, 1], [], []>} : vector<8x256xbf16>, vector<256x32xbf16>, vector<8x32xf32> -> vector<8x32xf32>
    %149 = arith.addf %138, %148 : vector<8x32xf32>
    %c0_48 = arith.constant 0 : index
    %c0_49 = arith.constant 0 : index
    %150 = vector.load %arg14[%c0_48, %c0_49] : memref<1x32xf32, #tpu.memory_space<vmem>>, vector<1x32xf32>
    %151 = vector.broadcast %150 : vector<1x32xf32> to vector<8x32xf32>
    %152 = arith.addf %149, %151 : vector<8x32xf32>
    %153 = arith.addf %112, %152 : vector<8x32xf32>
    %154 = vector.shape_cast %153 : vector<8x32xf32> to vector<1x8x32xf32>
    %155 = arith.truncf %154 : vector<1x8x32xf32> to vector<1x8x32xbf16>
    %c0_50 = arith.constant 0 : index
    %c0_51 = arith.constant 0 : index
    %c0_52 = arith.constant 0 : index
    %156 = vector.load %arg15[%c0_50, %c0_51, %c0_52] : memref<1x8x32xbf16, #tpu.memory_space<vmem>>, vector<1x8x32xbf16>
    tpu.vector_store %arg15[%c0_50, %c0_51, %c0_52], %155 {strides = array<i32>} : memref<1x8x32xbf16, #tpu.memory_space<vmem>>, vector<1x8x32xbf16>,
    return
  }
  func.func @transform_0(%arg0: i32) -> (i32, i32, i32) {
    %c0_i32 = arith.constant 0 : i32
    %c0_i32_0 = arith.constant 0 : i32
    %c0_i32_1 = arith.constant 0 : i32
    return %arg0, %c0_i32, %c0_i32_0 : i32, i32, i32
  }
  func.func @transform_1(%arg0: i32) -> (i32, i32) {
    %c0_i32 = arith.constant 0 : i32
    %c0_i32_0 = arith.constant 0 : i32
    %c0_i32_1 = arith.constant 0 : i32
    return %c0_i32, %c0_i32_0 : i32, i32
  }
  func.func @transform_2(%arg0: i32) -> (i32, i32) {
    %c0_i32 = arith.constant 0 : i32
    %c0_i32_0 = arith.constant 0 : i32
    %c0_i32_1 = arith.constant 0 : i32
    return %c0_i32, %c0_i32_0 : i32, i32
  }
  func.func @transform_3(%arg0: i32) -> (i32, i32) {
    %c0_i32 = arith.constant 0 : i32
    %c0_i32_0 = arith.constant 0 : i32
    %c0_i32_1 = arith.constant 0 : i32
    return %c0_i32, %c0_i32_0 : i32, i32
  }
  func.func @transform_4(%arg0: i32) -> (i32, i32) {
    %c0_i32 = arith.constant 0 : i32
    %c0_i32_0 = arith.constant 0 : i32
    %c0_i32_1 = arith.constant 0 : i32
    return %c0_i32, %c0_i32_0 : i32, i32
  }
  func.func @transform_5(%arg0: i32) -> (i32, i32) {
    %c0_i32 = arith.constant 0 : i32
    %c0_i32_0 = arith.constant 0 : i32
    %c0_i32_1 = arith.constant 0 : i32
    return %c0_i32, %c0_i32_0 : i32, i32
  }
  func.func @transform_6(%arg0: i32) -> (i32, i32) {
    %c0_i32 = arith.constant 0 : i32
    %c0_i32_0 = arith.constant 0 : i32
    %c0_i32_1 = arith.constant 0 : i32
    return %c0_i32, %c0_i32_0 : i32, i32
  }
  func.func @transform_7(%arg0: i32) -> (i32, i32) {
    %c0_i32 = arith.constant 0 : i32
    %c0_i32_0 = arith.constant 0 : i32
    %c0_i32_1 = arith.constant 0 : i32
    return %c0_i32, %c0_i32_0 : i32, i32
  }
  func.func @transform_8(%arg0: i32) -> (i32, i32) {
    %c0_i32 = arith.constant 0 : i32
    %c0_i32_0 = arith.constant 0 : i32
    %c0_i32_1 = arith.constant 0 : i32
    return %c0_i32, %c0_i32_0 : i32, i32
  }
  func.func @transform_9(%arg0: i32) -> (i32, i32) {
    %c0_i32 = arith.constant 0 : i32
    %c0_i32_0 = arith.constant 0 : i32
    %c0_i32_1 = arith.constant 0 : i32
    return %c0_i32, %c0_i32_0 : i32, i32
  }
  func.func @transform_10(%arg0: i32) -> (i32, i32) {
    %c0_i32 = arith.constant 0 : i32
    %c0_i32_0 = arith.constant 0 : i32
    %c0_i32_1 = arith.constant 0 : i32
    return %c0_i32, %c0_i32_0 : i32, i32
  }
  func.func @transform_11(%arg0: i32) -> (i32, i32) {
    %c0_i32 = arith.constant 0 : i32
    %c0_i32_0 = arith.constant 0 : i32
    %c0_i32_1 = arith.constant 0 : i32
    return %c0_i32, %c0_i32_0 : i32, i32
  }
  func.func @transform_12(%arg0: i32) -> (i32, i32) {
    %c0_i32 = arith.constant 0 : i32
    %c0_i32_0 = arith.constant 0 : i32
    %c0_i32_1 = arith.constant 0 : i32
    return %c0_i32, %c0_i32_0 : i32, i32
  }
  func.func @transform_13(%arg0: i32) -> (i32, i32) {
    %c0_i32 = arith.constant 0 : i32
    %c0_i32_0 = arith.constant 0 : i32
    %c0_i32_1 = arith.constant 0 : i32
    return %c0_i32, %c0_i32_0 : i32, i32
  }
  func.func @transform_14(%arg0: i32) -> (i32, i32, i32) {
    %c0_i32 = arith.constant 0 : i32
    %c0_i32_0 = arith.constant 0 : i32
    %c0_i32_1 = arith.constant 0 : i32
    return %arg0, %c0_i32, %c0_i32_0 : i32, i32, i32
  }
}

</mosaic_0001>

<bundles_post_ra>
// kernel: tpu_custom_call.1
= control target key start
LH: loop header
LB: loop body
LE: loop exit
PB: predicated region body
PF: predicated region fallthrough
CT: control target
= control target key end

     0   :  { %s2198_s0 = inlined_call_operand.vmem [shape: bf16[2,8,32], index: 0, kind: input, shape index: {}]   ;;  %s2199_s1 = inlined_call_operand.vmem [shape: f32[8,8], index: 1, kind: input, shape index: {}]   ;;  %s2200_s2 = inlined_call_operand.vmem [shape: f32[1,32], index: 2, kind: input, shape index: {}]   ;;  %s2201_s3 = inlined_call_operand.vmem [shape: f32[1,32], index: 3, kind: input, shape index: {}]   ;;  %s2202_s4 = inlined_call_operand.vmem [shape: bf16[32,96], index: 4, kind: input, shape index: {}]   ;;  %s2203_s5 = inlined_call_operand.vmem [shape: f32[1,96], index: 5, kind: input, shape index: {}]   ;;  %s2204_s6 = inlined_call_operand.vmem [shape: bf16[32,32], index: 6, kind: input, shape index: {}]   ;;  %s2205_s7 = inlined_call_operand.vmem [shape: f32[1,32], index: 7, kind: input, shape index: {}]   ;;  %s2206_s8 = inlined_call_operand.vmem [shape: f32[1,32], index: 8, kind: input, shape index: {}]   ;;  %s2207_s9 = inlined_call_operand.vmem [shape: f32[1,32], index: 9, kind: input, shape index: {}]   ;;  %s2208_s10 = inlined_call_operand.vmem [shape: bf16[32,256], index: 10, kind: input, shape index: {}]   ;;  %s2209_s11 = inlined_call_operand.vmem [shape: f32[1,256], index: 11, kind: input, shape index: {}]   ;;  %s2210_s12 = inlined_call_operand.vmem [shape: bf16[256,32], index: 12, kind: input, shape index: {}]   ;;  %s2211_s13 = inlined_call_operand.vmem [shape: f32[1,32], index: 13, kind: input, shape index: {}]   ;;  %s2212_s14 = inlined_call_operand.hbm [shape: bf16[2,8,32], index: 14, kind: output, shape index: {}]  }
   0x1   :  { %2213 = sst [smem:[#allocation5_spill]] %s2198_s0 }
   0x2   :  { %2214 = sst [smem:[#allocation6_spill]] %s2199_s1 }
   0x3   :  { %2215 = sst [smem:[#allocation7_spill]] %s2200_s2 }
   0x4   :  { %2216 = sst [smem:[#allocation8_spill]] %s2201_s3 }
   0x5   :  { %19 = vsyncpa [#allocation3], 0 }
   0x6   :  { %21 = vsyncpa [#allocation3 + $0x1], 0  ;;  %s1911_s29 = smov 0   ;;  %s1913_s30 = smov 0  }
   0x7   :  { %s1915_s15 = smov 0   ;;  %s1917_s16 = smov 0  }
   0x8 LB: > { %s1932_s17 = sadd.s32 4294967295, %s1822_s16   ;;  %s1496_s18 = sadd.s32 4294967294, %s1822_s16   ;;  %s1822_s16 = sphi %s1917_s16, %s2226_s16   ;;  %s1818_s15 = sphi %s1915_s15, %s2225_s15   ;;  %s1814_s30 = sphi %s1913_s30, %s2224_s30   ;;  %s1810_s29 = sphi %s1911_s29, %s2223_s29  }
   0x9   : > { %s1936_s19 = sadd.s32 1, %s1822_s16   ;;  %s333_s20 = sadd.s32 1, %s1818_s15 }
   0xa   : > { %s330_s21 = ssub.s32 %s1822_s16, %s1936_s19  ;;  %p343_p0 = scmp.ne.s32.totalorder %s1818_s15, %s1814_s30 }
   0xb   : > { %p331_p1 = scmp.eq.s32.totalorder %s330_s21, 0  ;;  %p344_p2 = scmp.eq.s32.totalorder %s1932_s17, 1 }
   0xc   : > { %p349_p3 = scmp.ne.s32.totalorder %s1814_s30, %s1810_s29  ;;  %p350_p4 = scmp.eq.s32.totalorder %s1496_s18, 1 }
   0xd   : > { %s1947_s22 = scalar_select %p331_p1, %s1818_s15, %s333_s20  }
   0xe   : > { %p1949_p5 = por %p344_p2, %p343_p0  ;;  %p1953_p6 = por %p350_p4, %p349_p3 }
   0xf   : > { %p1499_p7 = scmp.ge.s32.totalorder %s1822_s16, 1  ;;  %p414_p8 = scmp.lt.s32.totalorder %s1822_s16, 3 }
  0x11   : > { %p415_p9 = pnand %p1499_p7, %p414_p8 }
  0x12   : > { %p459_p10 = scmp.lt.s32.totalorder (!%p415_p9), %s1932_s17, 1  ;;  %vm468_vm0 = vcmask (!%p415_p9), 261120   ;;  %s2219_s0 = sld [smem:[#allocation5_spill]] (!%p415_p9)  ;;  %v1706_v8 = vld [vmem:[%s2202_s4] sm:$0xff] (!%p415_p9)   ;;  %v1824_v9 = vmov (!%p415_p9), 0.0   ;;  %vm1825_vm1 = vmmov (!%p415_p9), 0  }
  0x13   : > { %418 = sbr.rel (%p415_p9) target bundleno = 2506 (0x9ca), region = 76  ;;  %1592 = vmatprep.subr.bf16.mxu0 (!%p415_p9), %v1824_v9  ;;  %1596 = vmatprep.mubr.msk.bf16.mxu0 (!%p415_p9), %vm1825_vm1, %v1824_v9  ;;  %v1707_v10 = vld [vmem:[%s2202_s4 + $0x8] sm:$0xff] (!%p415_p9)   ;;  %s2220_s2 = sld [smem:[#allocation7_spill]] (!%p415_p9)  ;;  %v1504_v21 = vld [vmem:[%s2203_s5] ss:$0 sm:$0xff] (!%p415_p9)  ;;  %vm582_vm2 = vcmask (!%p415_p9), 64512  }
  0x14   : > { %1593 = vmatpush3.bf16.msra.mxu0 (!%p415_p9), %v1706_v8  ;;  %1612 = vmatprep.subr.bf16.mxu1 (!%p415_p9), %v1824_v9  ;;  %s2221_s3 = sld [smem:[#allocation8_spill]] (!%p415_p9)  ;;  %s1827_s27 = smov (!%p415_p9), 120   ;;  %vm845_vm3 = vcmask (!%p415_p9), 1043456   ;;  %vm1058_vm4 = vcmask (!%p415_p9), 130048   ;;  %vm1060_vm5 = vcmask (!%p415_p9), 195584   ;;  %vm1421_vm6 = vcmask (!%p415_p9), 257024  }
  0x15   : > { %1594 = vmatprep.subr.bf16.mxu0 (!%p415_p9), %v1824_v9  ;;  %1614 = vmatprep.mubr.msk.bf16.mxu1 (!%p415_p9), %vm1825_vm1, %v1824_v9  ;;  %s1828_s28 = smov (!%p415_p9), 112   ;;  %s1830_s20 = smov (!%p415_p9), 64  }
  0x16   : > { %s2222_s1 = sld [smem:[#allocation6_spill]] (!%p415_p9)  ;;  %s1832_s21 = smov (!%p415_p9), 16  }
  0x18   : > { %1595 = vmatpush3.bf16.msra.mxu0 (!%p415_p9), %v1707_v10 }
  0x19   : > { %1600 = vmatprep.subr.bf16.mxu0 (!%p415_p9), %v1824_v9  ;;  %v1502_v15 = vld [vmem:[%s2220_s2] ss:$0 sm:$0xff] (!%p415_p9) }
  0x1a   : > { %s460_s25 = scalar_select %p459_p10, %s1932_s17, 1  ;;  %v1503_v17 = vld [vmem:[%s2221_s3] ss:$0 sm:$0xff] }
  0x1c   : > { %s1501_s26 = sshll.u32 %s460_s25, 2  ;;  %v578_v44 = vld [vmem:[%s2222_s1] sm:$0xff]  ;;  %s1833_s25 = smov 24  }
  0x1d   : > { %s462_s18 = scalar_lea.vmem %s2219_s0, %s1501_s26  ;;  %s1826_s26 = smov 104  }
  0x1e   : > { %v464_v0 = vld [vmem:[%s462_s18] sm:$0xf]  ;;  %s1829_s18 = smov 96  }
  0x1f   : > { %v1964_v1 = vunpack.c.l.bf16 %v464_v0 }
  0x21   : > { %v469_v2 = vsel %vm468_vm0, %v1964_v1, 0.0 }
  0x22   : > { %470 = vadd.xlane.f32.xlu0 %v469_v2 }
  0xaf   : > { %v471_v3 = vpop.xlane.xlu0 %470 }
  0xb0   : > { %v473_v4 = vmul.f32 0.03125, %v471_v3 }
  0xb2   : > { %v474_v5 = vsub.f32 %v1964_v1, %v473_v4 }
  0xb4   : > { %v475_v6 = vmul.f32 %v474_v5, %v474_v5 }
  0xb6   : > { %v476_v7 = vsel %vm468_vm0, %v475_v6, 0.0 }
  0xb7   : > { %477 = vadd.xlane.f32.xlu0 %v476_v7 }
 0x144   : > { %v478_v11 = vpop.xlane.xlu0 %477 }
 0x145   : > { %v479_v12 = vmul.f32 0.03125, %v478_v11 }
 0x147   : > { %v480_v13 = vadd.f32 1e-05, %v479_v12 }
 0x149   : > { %1732 = vrsqrt.f32 %v480_v13 }
 0x153   : > { %v1733_v14 = vpop.eup %1732 }
 0x154   : > { %v482_v16 = vmul.f32 %v1733_v14, %v474_v5 }
 0x156   : > { %v489_v18 = vmul.f32 %v1502_v15, %v482_v16 }
 0x158   : > { %v496_v19 = vadd.f32 %v1503_v17, %v489_v18 }
 0x15a   : > { %v497_v20 = vpack.c.bf16 %v496_v19, %v496_v19 }
 0x15c   : > { %1597 = vmatmul.mubr.msk.bf16.vlgmr.msra.gmra.mrb[0].mxu0 %vm468_vm0, %v497_v20 }
 0x15d   : > { %1602 = vmatprep.mubr.msk.bf16.mxu0 %vm1825_vm1, %v1824_v9 }
 0x22f   : > { %v558_v22 = vpop.f32.mrb[0].mxu0 }
 0x230   : > { %v559_v23 = vadd.f32 %v1504_v21, %v558_v22  ;;  %v1598_v24 = vpop.f32.mrb[1].mxu0 }
 0x231   : > { %v561_v25 = vpop.f32.mrb[2].mxu0 }
 0x232   : > { %571 = vrot.lane.b32.xlu0 %v559_v23, %s1826_s26  ;;  %565 = vrot.lane.b32.xlu1 %v559_v23, %s1827_s27  ;;  %v1599_v26 = vpop.f32.mrb[3].mxu0  ;;  %v574_v27 = vpack.c.bf16 %v559_v23, %v559_v23  ;;  %s456_s26 = sand.u32 1, %s1814_s30  }
 0x233   : > { %s1500_s27 = sshll.u32 %s456_s26, 2 }
 0x234   : > { %s458_s1 = scalar_lea.vmem [#allocation2], %s1500_s27 }
 0x235   : > { %s1437_s2 = sshll.u32 %s458_s1, 4  ;;  %s2158_s2 = int_to_ptr.vmem [resolvable:$true] %s1437_s2 }
 0x236   : > { %568 = vrot.lane.b32.xlu1 %v559_v23, %s1828_s28  ;;  %s1424_s28 = scalar_lea.sflag [#allocation3], %s456_s26 }
 0x23a   : > { %580 = vrot.lane.b32.xlu1 %v574_v27, %s1829_s18 }
 0x2a4   : > { %v566_v28 = vpop.permute.xlu1 %565  ;;  %v572_v32 = vpop.permute.xlu0 %571 }
 0x2a5   : > { %v1996_v29 = vpack.c.bf16 %v566_v28, %v566_v28  ;;  %v577_v34 = vpack.c.bf16 %v572_v32, %v572_v32 }
 0x2a7   : > { %630 = vrot.lane.b32.xlu1 %v1996_v29, %s1829_s18 }
 0x2a8   : > { %v569_v30 = vpop.permute.xlu1 %568 }
 0x2a9   : > { %v1999_v31 = vpack.c.bf16 %v569_v30, %v569_v30 }
 0x2ab   : > { %679 = vrot.lane.b32.xlu1 %v1999_v31, %s1829_s18 }
 0x2ac   : > { %v581_v33 = vpop.permute.xlu1 %580 }
 0x2ad   : > { %v587_v35 = vsel %vm582_vm2, %v581_v33, 0 }
 0x2ae   : > { %1601 = vmatpush3.bf16.xpose.msra.mxu0 %v587_v35 }
 0x2af   : > { %728 = vrot.lane.b32.xlu1 %v577_v34, %s1829_s18  ;;  %1606 = vmatprep.subr.bf16.mxu0 %v1824_v9  ;;  %s1760_s18 = scalar_lea.vmem %s2158_s2, 64 }
 0x2b0   : > { %p1761_p11 = scmp.ne.s32.totalorder %s2158_s2, %s1760_s18 }
 0x2b2   : > { %p1762_p12 = pnand %p1761_p11, %p1949_p5 }
 0x2b3   : > { %840 = vrot.lane.b32.xlu1 %v574_v27, %s1830_s20 }
 0x2b4   : > { %p1763_p13 = pneg %p1762_p12 }
 0x2b5   : > { %1603 = vmatmul.mubr.msk.bf16.vlgmr.msra.gmra.mrb[4].mxu0 %vm582_vm2, %v574_v27 }
 0x2b6   : > { %1608 = vmatprep.mubr.msk.bf16.mxu0 %vm1825_vm1, %v1824_v9 }
 0x319   : > { %v631_v36 = vpop.permute.xlu1 %630 }
 0x31a   : > { %v636_v37 = vsel %vm582_vm2, %v631_v36, 0 }
 0x31b   : > { %1607 = vmatpush3.bf16.xpose.msra.mxu0 %v636_v37 }
 0x31c   : > { %1618 = vmatprep.subr.bf16.mxu0 %v1824_v9 }
 0x31d   : > { %v680_v38 = vpop.permute.xlu1 %679 }
 0x31e   : > { %v685_v39 = vsel %vm582_vm2, %v680_v38, 0 }
 0x31f   : > { %1613 = vmatpush3.bf16.xpose.msra.mxu1 %v685_v39 }
 0x320   : > { %1624 = vmatprep.subr.bf16.mxu1 %v1824_v9 }
 0x321   : > { %v729_v40 = vpop.permute.xlu1 %728 }
 0x322   : > { %v734_v41 = vsel %vm582_vm2, %v729_v40, 0  ;;  %1609 = vmatmul.mubr.msk.bf16.vlgmr.msra.gmra.mrb[8].mxu0 %vm582_vm2, %v1996_v29 }
 0x323   : > { %1619 = vmatpush3.bf16.xpose.msra.mxu0 %v734_v41  ;;  %1620 = vmatprep.mubr.msk.bf16.mxu0 %vm1825_vm1, %v1824_v9 }
 0x324   : > { %1630 = vmatprep.subr.bf16.mxu0 %v1824_v9 }
 0x325   : > { %v841_v42 = vpop.permute.xlu1 %840 }
 0x326   : > { %v847_v43 = vsel %vm845_vm3, %v841_v42, 0  ;;  %1615 = vmatmul.mubr.msk.bf16.vlgmr.msra.gmra.mrb[0].mxu1 %vm582_vm2, %v1999_v31 }
 0x327   : > { %1625 = vmatpush3.bf16.msra.mxu1 %v847_v43  ;;  %1626 = vmatprep.mubr.msk.bf16.mxu1 %vm1825_vm1, %v1824_v9 }
 0x328   : > { %1636 = vmatprep.subr.bf16.mxu1 %v1824_v9 }
 0x32a   : > { %1621 = vmatmul.mubr.msk.bf16.vlgmr.msra.gmra.mrb[12].mxu0 %vm582_vm2, %v577_v34 }
 0x32b   : > { %1632 = vmatprep.mubr.msk.bf16.mxu0 %vm1825_vm1, %v1824_v9 }
 0x388   : > { %v623_v45 = vpop.f32.mrb[4].mxu0 }
 0x389   : > { %v624_v46 = vadd.f32 %v623_v45, %v578_v44  ;;  %v1604_v47 = vpop.f32.mrb[5].mxu0 }
 0x38a   : > { %v626_v48 = vpop.f32.mrb[6].mxu0 }
 0x38b   : > { %v1605_v49 = vpop.f32.mrb[7].mxu0  ;;  %v776_v50 = vsel %vm582_vm2, %v624_v46, -inf }
 0x38c   : > { %777 = vmax.xlane.f32.xlu1 %v776_v50 }
 0x3f5   : > { %v672_v51 = vpop.f32.mrb[8].mxu0 }
 0x3f6   : > { %v673_v52 = vadd.f32 %v672_v51, %v578_v44  ;;  %v1610_v53 = vpop.f32.mrb[9].mxu0 }
 0x3f7   : > { %v675_v54 = vpop.f32.mrb[10].mxu0 }
 0x3f8   : > { %v1611_v55 = vpop.f32.mrb[11].mxu0  ;;  %v779_v56 = vsel %vm582_vm2, %v673_v52, -inf }
 0x3f9   : > { %v721_v57 = vpop.f32.mrb[0].mxu1  ;;  %780 = vmax.xlane.f32.xlu0 %v779_v56 }
 0x3fa   : > { %v722_v58 = vadd.f32 %v721_v57, %v578_v44  ;;  %v1616_v59 = vpop.f32.mrb[1].mxu1 }
 0x3fb   : > { %v724_v60 = vpop.f32.mrb[2].mxu1 }
 0x3fc   : > { %v1617_v61 = vpop.f32.mrb[3].mxu1  ;;  %v782_v62 = vsel %vm582_vm2, %v722_v58, -inf }
 0x3fd   : > { %783 = vmax.xlane.f32.xlu1 %v782_v62  ;;  %v770_v63 = vpop.f32.mrb[12].mxu0 }
 0x3fe   : > { %v771_v0 = vadd.f32 %v770_v63, %v578_v44  ;;  %v1622_v2 = vpop.f32.mrb[13].mxu0 }
 0x3ff   : > { %v773_v3 = vpop.f32.mrb[14].mxu0 }
 0x400   : > { %v1623_v4 = vpop.f32.mrb[15].mxu0  ;;  %v785_v5 = vsel %vm582_vm2, %v771_v0, -inf }
 0x401   : > { %786 = vmax.xlane.f32.xlu0 %v785_v5 }
 0x40e   : > { %937 = vrot.lane.b32.xlu1 %v1999_v31, %s1830_s20 }
 0x412   : > { %985 = vrot.lane.b32.xlu1 %v577_v34, %s1830_s20 }
 0x417   : > { %889 = vrot.lane.b32.xlu0 %v1996_v29, %s1830_s20  ;;  %s1831_s20 = smov 8  }
 0x419   : > { %v778_v6 = vpop.xlane.xlu1 %777 }
 0x41a   : > { %v788_v7 = vmax.f32 %v778_v6, -1e+30 }
 0x41c   : > { %v804_v8 = vsub.f32 %v624_v46, %v788_v7  ;;  %v792_v41 = vsub.f32 -1e+30, %v788_v7 }
 0x41e   : > { %v808_v10 = vmul.f32 1.442695, %v804_v8  ;;  %v796_v42 = vmul.f32 1.442695, %v792_v41  ;;  %v1708_v8 = vld [vmem:[%s2204_s6] sm:$0xff]  }
 0x420   : > { %1734 = vpow2.f32 %v808_v10 }
 0x42a   : > { %v1735_v11 = vpop.eup %1734 }
 0x42b   : > { %v836_v12 = vpack.c.bf16 %v1735_v11, %v1735_v11  ;;  %v820_v40 = vsel %vm582_vm2, %v1735_v11, 0.0  ;;  %v1709_v11 = vld [vmem:[%s2204_s6 + $0x8] sm:$0xff]  }
 0x42d   : > { %1627 = vmatmul.mubr.msk.bf16.vlgmr.msra.gmra.mrb[4].mxu1 %vm582_vm2, %v836_v12 }
 0x42e   : > { %1638 = vmatprep.mubr.msk.bf16.mxu1 %vm1825_vm1, %v1824_v9 }
 0x486   : > { %v781_v13 = vpop.xlane.xlu0 %780 }
 0x487   : > { %v789_v14 = vmax.f32 %v781_v13, -1e+30 }
 0x489   : > { %v805_v15 = vsub.f32 %v673_v52, %v789_v14  ;;  %v793_v56 = vsub.f32 -1e+30, %v789_v14 }
 0x48a   : > { %v784_v16 = vpop.xlane.xlu1 %783 }
 0x48b   : > { %v810_v17 = vmul.f32 1.442695, %v805_v15  ;;  %v790_v18 = vmax.f32 %v784_v16, -1e+30  ;;  %v798_v57 = vmul.f32 1.442695, %v793_v56 }
 0x48c   : > { %v1716_v56 = vld [vmem:[%s2210_s12 + $0x40] sm:$0xff]  }
 0x48d   : > { %v806_v19 = vsub.f32 %v722_v58, %v790_v18  ;;  %1736 = vpow2.f32 %v810_v17  ;;  %v794_v58 = vsub.f32 -1e+30, %v790_v18 }
 0x48e   : > { %v938_v20 = vpop.permute.xlu1 %937  ;;  %v787_v21 = vpop.xlane.xlu0 %786 }
 0x48f   : > { %v812_v22 = vmul.f32 1.442695, %v806_v19  ;;  %v943_v23 = vsel %vm845_vm3, %v938_v20, 0  ;;  %v791_v24 = vmax.f32 %v787_v21, -1e+30 }
 0x490   : > { %1637 = vmatpush3.bf16.msra.mxu1 %v943_v23  ;;  %v800_v59 = vmul.f32 1.442695, %v794_v58  ;;  %v1718_v58 = vld [vmem:[%s2210_s12 + $0x48] sm:$0xff]  }
 0x491   : > { %1648 = vmatprep.subr.bf16.mxu1 %v1824_v9  ;;  %1738 = vpow2.f32 %v812_v22  ;;  %v807_v25 = vsub.f32 %v771_v0, %v791_v24  ;;  %v795_v60 = vsub.f32 -1e+30, %v791_v24 }
 0x492   : > { %v890_v26 = vpop.permute.xlu0 %889  ;;  %v986_v30 = vpop.permute.xlu1 %985 }
 0x493   : > { %v895_v27 = vsel %vm845_vm3, %v890_v26, 0  ;;  %v814_v28 = vmul.f32 1.442695, %v807_v25  ;;  %v991_v33 = vsel %vm845_vm3, %v986_v30, 0  ;;  %v802_v61 = vmul.f32 1.442695, %v795_v60 }
 0x494   : > { %1631 = vmatpush3.bf16.msra.mxu0 %v895_v27  ;;  %v1720_v60 = vld [vmem:[%s2210_s12 + $0x50] sm:$0xff]  }
 0x495   : > { %1642 = vmatprep.subr.bf16.mxu0 %v1824_v9  ;;  %1740 = vpow2.f32 %v814_v28 }
 0x496   : > { %1742 = vpow2.f32 %v796_v42 }
 0x497   : > { %v1737_v29 = vpop.eup %1736 }
 0x498   : > { %v823_v31 = vsel %vm582_vm2, %v1737_v29, 0.0  ;;  %v837_v32 = vpack.c.bf16 %v1737_v29, %v1737_v29 }
 0x499   : > { %824 = vadd.xlane.f32.xlu0 %v823_v31 }
 0x49a   : > { %1633 = vmatmul.mubr.msk.bf16.vlgmr.msra.gmra.mrb[16].mxu0 %vm582_vm2, %v837_v32 }
 0x49b   : > { %v1739_v34 = vpop.eup %1738  ;;  %1643 = vmatpush3.bf16.msra.mxu0 %v991_v33  ;;  %1644 = vmatprep.mubr.msk.bf16.mxu0 %vm1825_vm1, %v1824_v9 }
 0x49c   : > { %v826_v35 = vsel %vm582_vm2, %v1739_v34, 0.0  ;;  %v838_v36 = vpack.c.bf16 %v1739_v34, %v1739_v34 }
 0x49d   : > { %827 = vadd.xlane.f32.xlu1 %v826_v35 }
 0x49e   : > { %1639 = vmatmul.mubr.msk.bf16.vlgmr.msra.gmra.mrb[8].mxu1 %vm582_vm2, %v838_v36 }
 0x49f   : > { %1652 = vmatprep.mubr.msk.bf16.mxu1 %vm1825_vm1, %v1824_v9  ;;  %v1741_v37 = vpop.eup %1740  ;;  %1649 = vmatpush3.bf16.msra.mxu1 %v1708_v8 }
 0x4a0   : > { %v829_v38 = vsel %vm582_vm2, %v1741_v37, 0.0  ;;  %v839_v39 = vpack.c.bf16 %v1741_v37, %v1741_v37  ;;  %v1743_v43 = vpop.eup %1742  ;;  %1650 = vmatprep.subr.bf16.mxu1 %v1824_v9 }
 0x4a1   : > { %830 = vadd.xlane.f32.xlu0 %v829_v38  ;;  %v816_v44 = vmul.f32 0.0, %v1743_v43 }
 0x4a2   : > { %1645 = vmatmul.mubr.msk.bf16.vlgmr.msra.gmra.mrb[20].mxu0 %vm582_vm2, %v839_v39  ;;  %v1516_v39 = vld [vmem:[%s2205_s7] ss:$0 sm:$0xff] }
 0x4a3   : > { %1651 = vmatpush3.bf16.msra.mxu1 %v1709_v11 }
 0x4a4   : > { %1570 = vmatprep.subr.bf16.mxu1 %v1716_v56 }
 0x4a5   : > { %821 = vadd.xlane.f32.xlu0 %v820_v40 }
 0x500   : > { %v883_v45 = vpop.f32.mrb[4].mxu1 }
 0x501   : > { %v1033_v46 = vadd.f32 %v883_v45, %v816_v44  ;;  %v1628_v47 = vpop.f32.mrb[5].mxu1 }
 0x502   : > { %v886_v48 = vpop.f32.mrb[6].mxu1 }
 0x503   : > { %v1629_v49 = vpop.f32.mrb[7].mxu1 }
 0x526   : > { %v825_v50 = vpop.xlane.xlu0 %824 }
 0x52a   : > { %v828_v3 = vpop.xlane.xlu1 %827 }
 0x52e   : > { %v831_v51 = vpop.xlane.xlu0 %830 }
 0x532   : > { %v822_v52 = vpop.xlane.xlu0 %821 }
 0x533   : > { %v832_v53 = vadd.f32 %v822_v52, %v816_v44  ;;  %v1712_v52 = vld [vmem:[%s2208_s10 + $0x4] ss:$8 sps:$4 sm:$0xff]  }
 0x534   : > { %1199 = vmatprep.subr.bf16.mxu0 %v1712_v52 }
 0x535   : > { %1744 = vrcp.f32 %v832_v53  ;;  %v1713_v53 = vld [vmem:[%s2208_s10 + $0x10] ss:$8 sps:$4 sm:$0xff]  }
 0x536   : > { %1746 = vpow2.f32 %v798_v57  ;;  %v1717_v57 = vld [vmem:[%s2210_s12] sm:$0xff]  }
 0x537   : > { %1748 = vpow2.f32 %v800_v59  ;;  %v1719_v59 = vld [vmem:[%s2210_s12 + $0x8] sm:$0xff]  }
 0x538   : > { %1750 = vpow2.f32 %v802_v61  ;;  %v1721_v61 = vld [vmem:[%s2210_s12 + $0x10] sm:$0xff]  }
 0x53f   : > { %v1745_v54 = vpop.eup %1744 }
 0x540   : > { %v1041_v55 = vmul.f32 %v1745_v54, %v1033_v46  ;;  %v1747_v62 = vpop.eup %1746  ;;  %v1715_v54 = vld [vmem:[%s2208_s10 + $0x14] ss:$8 sps:$4 sm:$0xff]  }
 0x541   : > { %v817_v63 = vmul.f32 0.0, %v1747_v62  ;;  %v1749_v0 = vpop.eup %1748  ;;  %v1722_v62 = vld [vmem:[%s2210_s12 + $0x58] sm:$0xff]  }
 0x542   : > { %v818_v4 = vmul.f32 0.0, %v1749_v0  ;;  %v1751_v5 = vpop.eup %1750  ;;  %v1724_v0 = vld [vmem:[%s2210_s12 + $0x60] sm:$0xff]  }
 0x543   : > { %v833_v2 = vadd.f32 %v825_v50, %v817_v63  ;;  %v819_v7 = vmul.f32 0.0, %v1751_v5 }
 0x544   : > { %v834_v6 = vadd.f32 %v828_v3, %v818_v4  ;;  %v1726_v3 = vld [vmem:[%s2210_s12 + $0x68] sm:$0xff]  }
 0x545   : > { %1752 = vrcp.f32 %v833_v2  ;;  %v835_v10 = vadd.f32 %v831_v51, %v819_v7  ;;  %v1725_v2 = vld [vmem:[%s2210_s12 + $0x20] sm:$0xff]  }
 0x546   : > { %1754 = vrcp.f32 %v834_v6 }
 0x547   : > { %1756 = vrcp.f32 %v835_v10  ;;  %v1520_v10 = vld [vmem:[%s2206_s8] ss:$0 sm:$0xff] }
 0x54f   : > { %v1753_v15 = vpop.eup %1752 }
 0x550   : > { %v1755_v22 = vpop.eup %1754 }
 0x551   : > { %v1757_v28 = vpop.eup %1756 }
 0x56d   : > { %v931_v12 = vpop.f32.mrb[16].mxu0 }
 0x56e   : > { %v1034_v13 = vadd.f32 %v931_v12, %v817_v63  ;;  %v1634_v14 = vpop.f32.mrb[17].mxu0  ;;  %v1723_v63 = vld [vmem:[%s2210_s12 + $0x18] sm:$0xff]   ;;  %v1521_v12 = vld [vmem:[%s2207_s9] ss:$0 sm:$0xff] }
 0x56f   : > { %v934_v16 = vpop.f32.mrb[18].mxu0 }
 0x570   : > { %v1042_v17 = vmul.f32 %v1753_v15, %v1034_v13  ;;  %v1635_v18 = vpop.f32.mrb[19].mxu0  ;;  %v1728_v16 = vld [vmem:[%s2210_s12 + $0x70] sm:$0xff]  }
 0x571   : > { %v979_v19 = vpop.f32.mrb[8].mxu1  ;;  %v1730_v18 = vld [vmem:[%s2210_s12 + $0x78] sm:$0xff]  }
 0x572   : > { %v1035_v20 = vadd.f32 %v979_v19, %v818_v4  ;;  %v1640_v21 = vpop.f32.mrb[9].mxu1  ;;  %1046 = vrot.lane.b32.xlu1 %v1042_v17, %s1831_s20  ;;  %v1727_v4 = vld [vmem:[%s2210_s12 + $0x28] sm:$0xff]   ;;  %v1729_v17 = vld [vmem:[%s2210_s12 + $0x30] sm:$0xff]   ;;  %v1731_v19 = vld [vmem:[%s2210_s12 + $0x38] sm:$0xff]   ;;  %s1545_s20 = sshll.u32 %s1932_s17, 6  ;;  %s1835_s17 = smov [#allocation2]  }
 0x573   : > { %v982_v9 = vpop.f32.mrb[10].mxu1  ;;  %s1764_s27 = sshll.u32 %s1835_s17, 4  ;;  %s1765_s27 = int_to_ptr.vmem [resolvable:$false] %s1764_s27 }
 0x574   : > { %v1043_v23 = vmul.f32 %v1755_v22, %v1035_v20  ;;  %v1641_v24 = vpop.f32.mrb[11].mxu1  ;;  %v1166_v20 = vlaneseq  ;;  %v1164_v9 = vld [vmem:[%s2209_s11] sm:$0x3]  ;;  %s1766_s3 = scalar_lea.vmem %s1765_s27, 128  ;;  %p1767_p0 = scmp.lt.s32.totalorder %s2158_s2, %s1765_s27 }
 0x575   : > { %v1027_v25 = vpop.f32.mrb[20].mxu0  ;;  %p1768_p1 = scmp.lt.s32.totalorder %s1766_s3, %s1760_s18 }
 0x576   : > { %1050 = vrot.lane.b32.xlu0 %v1043_v23, %s1832_s21  ;;  %v1036_v26 = vadd.f32 %v1027_v25, %v819_v7  ;;  %v1646_v27 = vpop.f32.mrb[21].mxu0  ;;  %v1167_v21 = vshrl.u32 %v1166_v20, 7 }
 0x577   : > { %v1030_v29 = vpop.f32.mrb[22].mxu0  ;;  %p1769_p2 = por %p1768_p1, %p1767_p0 }
 0x578   : > { %v1044_v30 = vmul.f32 %v1757_v28, %v1036_v26  ;;  %v1647_v31 = vpop.f32.mrb[23].mxu0  ;;  %v1168_v22 = vsub.s32 0, %v1167_v21  ;;  %v1172_v23 = vsub.s32 1, %v1167_v21 }
 0x579   : > { %p1770_p3 = pnand %p1769_p2, %p1763_p13 }
 0x57a   : > { %1054 = vrot.lane.b32.xlu1 %v1044_v30, %s1833_s25  ;;  %v1169_v24 = vrot.slane %v1164_v9, %v1168_v22  ;;  %v1173_v25 = vrot.slane %v1164_v9, %v1172_v23  ;;  %s2156_s25 = scalar_lea.hbm %s2212_s14, %s1545_s20 }
 0x5e4   : > { %v1047_v32 = vpop.permute.xlu1 %1046 }
 0x5e5   : > { %v1057_v34 = vsel %vm582_vm2, %v1041_v55, %v1047_v32  ;;  %v1834_v55 = vmov 0  }
 0x5e6   : > { %1231 = vmatprep.mubr.bf16.mxu0 %v1834_v55 }
 0x5e8   : > { %v1051_v33 = vpop.permute.xlu0 %1050 }
 0x5e9   : > { %v1059_v35 = vsel %vm1058_vm4, %v1057_v34, %v1051_v33 }
 0x5ec   : > { %v1055_v36 = vpop.permute.xlu1 %1054 }
 0x5ed   : > { %v1061_v37 = vsel %vm1060_vm5, %v1059_v35, %v1055_v36 }
 0x5ee   : > { %v1062_v38 = vpack.c.bf16 %v1061_v37, %v1061_v37  ;;  %v1527_v37 = vld [vmem:[%s2211_s13] ss:$0 sm:$0xff] }
 0x5f0   : > { %1653 = vmatmul.mubr.msk.bf16.vlgmr.msra.gmra.mrb[12].mxu1 %vm468_vm0, %v1062_v38 }
 0x5f1   : > { %1571 = vmatpush3.bf16.msra.mxu1 %v1717_v57 }
 0x5f2   : > { %1572 = vmatprep.subr.bf16.mxu1 %v1718_v58 }
 0x5f5   : > { %1573 = vmatpush3.bf16.msra.mxu1 %v1719_v59 }
 0x5f6   : > { %1574 = vmatprep.subr.bf16.mxu1 %v1720_v60 }
 0x5f9   : > { %1575 = vmatpush3.bf16.msra.mxu1 %v1721_v61 }
 0x5fa   : > { %1576 = vmatprep.subr.bf16.mxu1 %v1722_v62 }
 0x5fd   : > { %1577 = vmatpush3.bf16.msra.mxu1 %v1723_v63 }
 0x5fe   : > { %1578 = vmatprep.subr.bf16.mxu1 %v1724_v0 }
 0x601   : > { %1579 = vmatpush3.bf16.msra.mxu1 %v1725_v2 }
 0x602   : > { %1580 = vmatprep.subr.bf16.mxu1 %v1726_v3 }
 0x605   : > { %1581 = vmatpush3.bf16.msra.mxu1 %v1727_v4 }
 0x606   : > { %1582 = vmatprep.subr.bf16.mxu1 %v1728_v16 }
 0x609   : > { %1583 = vmatpush3.bf16.msra.mxu1 %v1729_v17 }
 0x60a   : > { %1584 = vmatprep.subr.bf16.mxu1 %v1730_v18 }
 0x60d   : > { %1585 = vmatpush3.bf16.msra.mxu1 %v1731_v19 }
 0x6c3   : > { %v1123_v40 = vpop.f32.mrb[12].mxu1 }
 0x6c4   : > { %v1124_v41 = vadd.f32 %v1516_v39, %v1123_v40  ;;  %v1654_v42 = vpop.f32.mrb[13].mxu1 }
 0x6c5   : > { %v1126_v43 = vpop.f32.mrb[14].mxu1 }
 0x6c6   : > { %v2071_v44 = vadd.f32 %v1124_v41, %v1964_v1  ;;  %v1655_v45 = vpop.f32.mrb[15].mxu1  ;;  %v1710_v1 = vld [vmem:[%s2208_s10] ss:$8 sps:$4 sm:$0xff]  }
 0x6c7   : > { %1200 = vmatpush1.bf16.msra.mxu0 %v1710_v1 }
 0x6c8   : > { %v1132_v46 = vsel %vm468_vm0, %v2071_v44, 0.0  ;;  %1201 = vmatprep.subr.bf16.mxu0 %v1715_v54 }
 0x6c9   : > { %1133 = vadd.xlane.f32.xlu1 %v1132_v46 }
 0x6cb   : > { %1202 = vmatpush1.bf16.msra.mxu0 %v1713_v53 }
 0x756   : > { %v1134_v47 = vpop.xlane.xlu1 %1133 }
 0x757   : > { %v1135_v48 = vmul.f32 0.03125, %v1134_v47 }
 0x759   : > { %v1136_v49 = vsub.f32 %v2071_v44, %v1135_v48 }
 0x75b   : > { %v1137_v50 = vmul.f32 %v1136_v49, %v1136_v49 }
 0x75d   : > { %v1138_v51 = vsel %vm468_vm0, %v1137_v50, 0.0 }
 0x75e   : > { %1139 = vadd.xlane.f32.xlu0 %v1138_v51 }
 0x7eb   : > { %v1140_v5 = vpop.xlane.xlu0 %1139 }
 0x7ec   : > { %v1141_v6 = vmul.f32 0.03125, %v1140_v5 }
 0x7ee   : > { %v1142_v7 = vadd.f32 1e-05, %v1141_v6 }
 0x7f0   : > { %1758 = vrsqrt.f32 %v1142_v7 }
 0x7fa   : > { %v1759_v8 = vpop.eup %1758 }
 0x7fb   : > { %v1144_v11 = vmul.f32 %v1759_v8, %v1136_v49 }
 0x7fd   : > { %v1151_v13 = vmul.f32 %v1520_v10, %v1144_v11 }
 0x7ff   : > { %v1158_v14 = vadd.f32 %v1521_v12, %v1151_v13 }
 0x801   : > { %v1159_v15 = vpack.c.bf16 %v1158_v14, %v1158_v14 }
 0x803   : > { %1526 = vmatmul.mubr.msk.bf16.vlgmr.msra.gmra.mrb[24].mxu0 %vm468_vm0, %v1159_v15 }
 0x8d6   : > { %v1233_v26 = vpop.f32.mrb[24].mxu0 }
 0x8d7   : > { %v1234_v27 = vadd.f32 %v1233_v26, %v1169_v24  ;;  %v1235_v28 = vpop.f32.mrb[25].mxu0 }
 0x8d8   : > { %v1236_v29 = vadd.f32 %v1235_v28, %v1173_v25  ;;  %v1237_v30 = vpop.f32.mrb[26].mxu0 }
 0x8d9   : > { %v1240_v31 = vmax.f32 %v1234_v27, 0.0  ;;  %v1238_v32 = vpop.f32.mrb[27].mxu0 }
 0x8da   : > { %v1241_v33 = vmax.f32 %v1236_v29, 0.0 }
 0x8db   : > { %v1242_v35 = vpack.c.bf16 %v1240_v31, %v1240_v31 }
 0x8dc   : > { %v1243_v34 = vpack.c.bf16 %v1241_v33, %v1241_v33 }
 0x8de   : > { %1411 = vmatprep.mubr.bf16.mxu1 %v1243_v34 }
 0x8df   : > { %1412 = vmatmul.mubr.bf16.vlgmr.msra.gmra.mrb[16].mxu1 %v1242_v35 }
 0x9b2   : > { %v1586_v36 = vpop.f32.mrb[16].mxu1 }
 0x9b3   : > { %v1587_v38 = vpop.f32.mrb[17].mxu1 }
 0x9b4   : > { %v1588_v39 = vadd.f32 %v1587_v38, %v1586_v36  ;;  %v1589_v40 = vpop.f32.mrb[18].mxu1 }
 0x9b5   : > { %v1590_v41 = vpop.f32.mrb[19].mxu1 }
 0x9b6   : > { %v1414_v42 = vadd.f32 %v1588_v39, %v1527_v37 }
 0x9b8   : > { %v1419_v43 = vadd.f32 %v1414_v42, %v2071_v44 }
 0x9ba   : > { %v1420_v45 = vpack.c.bf16 %v1419_v43, %v1419_v43 }
 0x9bc   : > { %1422 = vst.msk [vmem:[%s458_s1] sm:$0xf] %vm1421_vm6, %v1420_v45 }
 0x9bd   : > { %1773 = shalt.err (!%p1770_p3)
}
 0x9be   : > { %s1774_s26 = scalar_lea.hbm %s2156_s25, 64  ;;  %s1778_s21 = scalar_lea.hbm %s2212_s14, 128 }
 0x9bf   : > { %p1775_p4 = scmp.ne.s32.totalorder %s2156_s25, %s1774_s26  ;;  %p1779_p9 = scmp.lt.u32.totalorder %s2156_s25, %s2212_s14 }
 0x9c0   : > { %p1780_p10 = scmp.lt.u32.totalorder %s1778_s21, %s1774_s26  ;;  %p1782_p12 = scmp.lt.u32.totalorder %s1774_s26, %s2156_s25 }
 0x9c1   : > { %p1776_p7 = pnand %p1775_p4, %p1949_p5 }
 0x9c2   : > { %p1781_p11 = por %p1780_p10, %p1779_p9 }
 0x9c3   : > { %p1777_p8 = pneg %p1776_p7 }
 0x9c4   : > { %p1783_p13 = por %p1782_p12, %p1781_p11 }
 0x9c6   : > { %p1784_p0 = pnand %p1783_p13, %p1777_p8 }
 0x9c8   : > { %1787 = shalt.err (!%p1784_p0)
}
 0x9c9   : > { %1656 = dma.vmem_to_hbm [thread:$0]  (%p1949_p5), %s2158_s2, 64, %s2156_s25, %s1424_s28  }
 0x9ca PF: > { %p1662_p1 = scmp.ge.s32.totalorder %s1822_s16, 2  ;;  %s1449_s3 = sand.u32 1, %s1810_s29  }
 0x9cb   : > { %s1450_s18 = scalar_lea.sflag [#allocation3], %s1449_s3 }
 0x9cc   : > { %p1659_p2 = pnand %p1662_p1, %p1953_p6 }
 0x9ce   : > { %1805 = dma.done.wait (!%p1659_p2), %s1450_s18, 64  }
 0x9cf   : > { %1807 = vsyncadd (!%p1659_p2), %s1450_s18, 4294967232  ;;  %p24_p3 = scmp.ge.s32.totalorder %s1936_s19, 4   ;;  %s2223_s29 = smov %s1814_s30 }
 0x9d0   : > { %s2224_s30 = smov %s1818_s15  ;;  %s2225_s15 = smov %s1947_s22 }
 0x9d1   : > { %s2226_s16 = smov %s1936_s19  ;;  %26 = sbr.rel (!%p24_p3) target bundleno = 8 (0x8), region = 111 }
 0x9d8   :  { %1455 = vsyncpa [#allocation3], 1 }
 0x9d9   :  { %1457 = vsyncpa [#allocation3 + $0x1], 1 }

</bundles_post_ra>
